<compile_context>
chip_gen: v6e
topology: v6e:2x2x1
jax: 0.10.0
libtpu: 0.0.40
codegen_flags: <defaults>
</compile_context>

<pallas_src>
import functools

import jax
import jax.numpy as jnp
from jax.experimental import pallas as pl
from jax.experimental.pallas import tpu as pltpu


_TARGET_TILE_BYTES = 8 * 1024 * 1024          # ~8 MiB per tile (per grid step)
_LANE_CANDIDATES = (1024, 512, 256, 128)      # lane-dense last dims (multiples of 128)
_SUBLANE = {4: 8, 2: 16, 1: 32}               # sublane packing per itemsize


def _relu_kernel(x_ref, o_ref):
    # Elementwise ReLU on the whole VMEM tile (one VPU max per vreg).
    o_ref[...] = jnp.maximum(x_ref[...], jnp.zeros((), dtype=x_ref.dtype))


def _round_up(a: int, b: int) -> int:
    return (a + b - 1) // b * b


@functools.partial(
    jax.jit, static_argnames=("target_tile_bytes", "min_pallas_bytes")
)
def lrp_relu_forward(
    x: jax.Array,
    *,
    target_tile_bytes: int = _TARGET_TILE_BYTES,
    min_pallas_bytes: int = 1 << 20,
) -> jax.Array:
    """Forward pass of LRPRelu: relu(x). Works for any shape/dtype."""
    total = x.size
    itemsize = jnp.dtype(x.dtype).itemsize

    # XLA-fused fallback when the standalone kernel cannot pay for itself:
    #  * tiny activations (pallas_call fixed cost dominates, common in LRP layers)
    #  * unsupported itemsize (no clean TPU sublane packing, e.g. 8-byte dtypes)
    if total == 0 or total * itemsize < min_pallas_bytes or itemsize not in _SUBLANE:
        return jnp.maximum(x, jnp.zeros((), dtype=x.dtype))

    # Pick the widest lane-dense last dim that divides the flat size so the
    # (rows, lane) reshape is a free bitcast (no pad / slice HBM round-trips).
    lane = next((c for c in _LANE_CANDIDATES if total % c == 0), None)
    if lane is None:
        # Ragged size: a pad + kernel + slice would cost ~3x the ideal HBM
        # traffic, so let XLA fuse a plain max instead.
        return jnp.maximum(x, jnp.zeros((), dtype=x.dtype))

    sublane = _SUBLANE[itemsize]
    rows = total // lane

    if rows <= sublane:
        # Single full-extent block (block dim == array dim is always legal).
        tile_rows = rows
    else:
        # Byte-budgeted, sublane-aligned tile; keep >= 2 grid steps so both
        # v7x TensorCores get work under dimension_semantics=("parallel",).
        tile_rows = max(
            sublane, (target_tile_bytes // (lane * itemsize)) // sublane * sublane
        )
        tile_rows = min(tile_rows, _round_up(pl.cdiv(rows, 2), sublane))

    grid = (pl.cdiv(rows, tile_rows),)          # final block may be ragged (masked)
    tile_bytes = tile_rows * lane * itemsize
    # 2x double-buffered input + 2x output tiles, plus headroom for the compiler.
    vmem_limit = int(min(48 << 20, max(16 << 20, 4 * tile_bytes + (8 << 20))))

    x2d = x.reshape(rows, lane)                 # contiguous reshape: no copy

    out2d = pl.pallas_call(
        _relu_kernel,
        out_shape=jax.ShapeDtypeStruct((rows, lane), x.dtype),
        grid_spec=pltpu.PrefetchScalarGridSpec(
            num_scalar_prefetch=0,
            grid=grid,
            in_specs=[pl.BlockSpec((tile_rows, lane), lambda i: (i, 0))],
            out_specs=pl.BlockSpec((tile_rows, lane), lambda i: (i, 0)),
        ),
        compiler_params=pltpu.CompilerParams(
            dimension_semantics=("parallel",),
            vmem_limit_bytes=vmem_limit,
        ),
    )(x2d)

    return out2d.reshape(x.shape)


# TODO(synk): the LRP relevance-propagation (custom backward of autograd_fn) is
# not implemented here; only the forward relu(x) semantics are covered.


if __name__ == "__main__":
    key = jax.random.PRNGKey(0)
    k1, k2, k3, k4, k5 = jax.random.split(key, 5)

    # 1) Conv-net-like activation NCHW (2, 4, 16, 16); force the Pallas path
    #    even though it is tiny (min_pallas_bytes=0).  rows=2 -> single block.
    x = jax.random.normal(k1, (2, 4, 16, 16), dtype=jnp.float32)
    out = jax.block_until_ready(lrp_relu_forward(x, min_pallas_bytes=0))
    assert out.shape == x.shape and out.dtype == x.dtype
    assert jnp.array_equal(out, jnp.maximum(x, 0.0)), "mismatch (f32, single block)"

    # 2) Larger activation -> multi-step grid (rows=64, two parallel steps).
    y = jax.random.normal(k2, (4, 16, 32, 32), dtype=jnp.float32)
    out_y = jax.block_until_ready(lrp_relu_forward(y, min_pallas_bytes=0))
    assert jnp.array_equal(out_y, jnp.maximum(y, 0.0)), "mismatch (multi-step grid)"

    # 3) rows (=40) not divisible by tile_rows (=24) -> ragged, masked final block.
    z = jax.random.normal(k3, (10, 4, 32, 32), dtype=jnp.float32)
    out_z = jax.block_until_ready(lrp_relu_forward(z, min_pallas_bytes=0))
    assert jnp.array_equal(out_z, jnp.maximum(z, 0.0)), "mismatch (ragged final block)"

    # 4) bf16 activations (sublane multiple 16).
    b = jax.random.normal(k4, (2, 4, 16, 16), dtype=jnp.bfloat16)
    out_b = jax.block_until_ready(lrp_relu_forward(b, min_pallas_bytes=0))
    assert out_b.dtype == jnp.bfloat16
    assert jnp.array_equal(
        out_b, jnp.maximum(b, jnp.zeros((), jnp.bfloat16))
    ), "mismatch (bf16)"

    # 5) Odd, non-lane-divisible shape -> XLA-fused fallback path.
    w = jax.random.normal(k5, (3, 7, 19, 23), dtype=jnp.float32)
    out_w = jax.block_until_ready(lrp_relu_forward(w, min_pallas_bytes=0))
    assert jnp.array_equal(out_w, jnp.maximum(w, 0.0)), "mismatch (fallback)"

    print("KERNEL_OK")
</pallas_src>

<mosaic_0001>
module attributes {stable_mosaic.version = 11 : i64} {
  func.func @_relu_kernel(%arg0: i32, %arg1: memref<2x1024xf32, #tpu.memory_space<vmem>>, %arg2: memref<2x1024xf32, #tpu.memory_space<vmem>>) attributes {dimension_semantics = [#tpu.dimension_semantics<parallel>], iteration_bounds = array<i64: 1>, scalar_prefetch = 0 : i64, scratch_operands = 0 : i64, tpu.core_type = #tpu.core_type<tc>, window_params = [{transform_indices = @transform_0, window_bounds = array<i64: 2, 1024>}, {transform_indices = @transform_1, window_bounds = array<i64: 2, 1024>}]} {
    %c0 = arith.constant 0 : index
    %c0_0 = arith.constant 0 : index
    %0 = vector.load %arg1[%c0, %c0_0] : memref<2x1024xf32, #tpu.memory_space<vmem>>, vector<2x1024xf32>
    %cst = arith.constant 0.000000e+00 : f32
    %1 = vector.broadcast %cst : f32 to vector<2x1024xf32>
    %2 = arith.maximumf %0, %1 : vector<2x1024xf32>
    %c0_1 = arith.constant 0 : index
    %c0_2 = arith.constant 0 : index
    %3 = vector.load %arg2[%c0_1, %c0_2] : memref<2x1024xf32, #tpu.memory_space<vmem>>, vector<2x1024xf32>
    tpu.vector_store %arg2[%c0_1, %c0_2], %2 {strides = array<i32>} : memref<2x1024xf32, #tpu.memory_space<vmem>>, vector<2x1024xf32>,
    return
  }
  func.func @transform_0(%arg0: i32) -> (i32, i32) {
    %c0_i32 = arith.constant 0 : i32
    %c0_i32_0 = arith.constant 0 : i32
    return %arg0, %c0_i32 : i32, i32
  }
  func.func @transform_1(%arg0: i32) -> (i32, i32) {
    %c0_i32 = arith.constant 0 : i32
    %c0_i32_0 = arith.constant 0 : i32
    return %arg0, %c0_i32 : i32, i32
  }
}

</mosaic_0001>

<bundles_post_ra>
// kernel: lrp_relu_forward.1
= control target key start
LH: loop header
LB: loop body
LE: loop exit
PB: predicated region body
PF: predicated region fallthrough
CT: control target
= control target key end

     0   :  { %s40_s0 = inlined_call_operand.vmem [shape: f32[2,1024], index: 0, kind: input, shape index: {}]   ;;  %s41_s1 = inlined_call_operand.vmem [shape: f32[2,1024], index: 1, kind: output, shape index: {}]  }
   0x1   :  { %v8_v0 = vld [vmem:[%s40_s0] sm:$0xff]  ;;  %v9_v1 = vld [vmem:[%s40_s0 + $0x8] sm:$0xff] }
   0x2   :  { %v10_v2 = vmax.f32 %v8_v0, 0.0  ;;  %v11_v3 = vmax.f32 %v9_v1, 0.0 }
   0x4   :  { %12 = vst [vmem:[%s41_s1] sm:$0xff] %v10_v2  ;;  %13 = vst [vmem:[%s41_s1 + $0x8] sm:$0xff] %v11_v3 }

</bundles_post_ra>
